<compile_context>
chip_gen: v7x
topology: tpu7x:2x2x1
jax: 0.10.0
libtpu: 0.0.40
codegen_flags: <defaults>
</compile_context>

<pallas_src>
import jax
import jax.numpy as jnp
from jax.experimental import pallas as pl
from jax.experimental.pallas import tpu as pltpu


def _align(x: int, m: int) -> int:
    return ((x + m - 1) // m) * m


# -----------------------------------------------------------------------------
# Parameter packing (runs once, outside the kernel)
# -----------------------------------------------------------------------------
def pack_critic_params(params, state_size, hidden_state, hidden_action,
                       param_dtype=jnp.float32):
    """Pack all Linear weights/biases into ONE (R, Cp) buffer.

    Layout (Cp = hidden rounded up to 128 lanes, zero padded; exact):
      row 0              : b1 = [bs, ba, 0...]          (fused first-layer bias)
      row 1, col 0       : b3
      row 2              : b2 (cols 0:H)
      rows r_ws .. +S    : W1s  -> ws in cols 0:Hs      (state rows of layer 1)
      row  r_wa          : W1a  -> wa in cols Hs:H      (action row of layer 1)
      rows r_w2 .. +Cp   : W2   (cols/rows 0:H, rest 0)
      rows r_w3 .. +Cp   : W3   (col 0, rows 0:H)
    """
    ws, bs, wa, ba, w2, b2, w3, b3 = [jnp.asarray(p, jnp.float32) for p in params]
    S, Hs, Ha = state_size, hidden_state, hidden_action
    H = Hs + Ha
    Cp = max(128, _align(H, 128))

    r_b1, r_b3, r_b2 = 0, 1, 2
    r_ws = 8
    r_wa = _align(r_ws + S, 8)
    r_w2 = _align(r_wa + 1, 8)
    r_w3 = _align(r_w2 + Cp, 8)
    R = _align(r_w3 + Cp, 8)

    P = jnp.zeros((R, Cp), jnp.float32)
    P = P.at[r_b1, 0:Hs].set(bs)
    P = P.at[r_b1, Hs:H].set(ba)
    P = P.at[r_b2, 0:H].set(b2)
    P = P.at[r_b3, 0].set(b3[0])
    P = P.at[r_ws:r_ws + S, 0:Hs].set(ws)          # state part of fused layer 1
    P = P.at[r_wa, Hs:H].set(wa[0, :])             # action part of fused layer 1
    P = P.at[r_w2:r_w2 + H, 0:H].set(w2)
    P = P.at[r_w3:r_w3 + H, 0].set(w3[:, 0])
    P = P.astype(param_dtype)                      # bf16 weights packed once here

    meta = dict(S=S, Hs=Hs, Ha=Ha, H=H, Cp=Cp, R=R,
                r_ws=r_ws, r_wa=r_wa, r_w2=r_w2, r_w3=r_w3)
    return P, meta


# -----------------------------------------------------------------------------
# Kernel
# -----------------------------------------------------------------------------
def _make_kernel(meta, mm_dtype):
    S, Cp = meta["S"], meta["Cp"]
    r_ws, r_wa, r_w2, r_w3 = meta["r_ws"], meta["r_wa"], meta["r_w2"], meta["r_w3"]

    def kernel(s_ref, a_ref, p_ref, out_ref):
        s = s_ref[...].astype(mm_dtype)            # (TB, S)
        a = a_ref[...]                             # (TB, 1) f32

        b1 = p_ref[0:1, :]                         # (1, Cp)
        b3 = p_ref[1:2, 0:1]                       # (1, 1)
        b2 = p_ref[2:3, :]                         # (1, Cp)
        w1s = p_ref[r_ws:r_ws + S, :]              # (S, Cp)
        w1a = p_ref[r_wa:r_wa + 1, :]              # (1, Cp)
        w2 = p_ref[r_w2:r_w2 + Cp, :]              # (Cp, Cp)
        w3 = p_ref[r_w3:r_w3 + Cp, 0:1]            # (Cp, 1)

        # fused first layer: h == [relu(s@ws+bs), relu(a@wa+ba), 0...] exactly
        h = jnp.dot(s, w1s, preferred_element_type=jnp.float32)
        h = jnp.maximum(h + a * w1a + b1, 0.0)

        # layer 2 on the (virtually concatenated) features
        x = jnp.dot(h.astype(mm_dtype), w2, preferred_element_type=jnp.float32)
        x = jnp.maximum(x + b2, 0.0)

        # scalar head
        y = jnp.dot(x.astype(mm_dtype), w3, preferred_element_type=jnp.float32)
        out_ref[...] = (y + b3).astype(out_ref.dtype)

    return kernel


# -----------------------------------------------------------------------------
# Wrapper
# -----------------------------------------------------------------------------
def critic_forward(s, a, packed_params, meta, *, block_b=None):
    S, Cp, R = meta["S"], meta["Cp"], meta["R"]
    B = s.shape[0]
    s = s.astype(jnp.float32)
    a = a.astype(jnp.float32)
    mm_dtype = packed_params.dtype

    # Batch tile: large default (per-grid-step overhead ~0.35 us), but keep at
    # least 2 grid steps when the batch allows it so v7x's second TensorCore
    # gets work through the "parallel" batch axis.
    if block_b is None:
        target = 1024                              # sweep 512..4096 if desired
        half = _align(-(-B // 2), 8)
        block_b = max(8, min(target, half))
    else:
        block_b = max(8, _align(block_b, 8))

    grid = (pl.cdiv(B, block_b),)                  # ragged last tile handled by Pallas
    kernel = _make_kernel(meta, mm_dtype)

    pitem = jnp.dtype(mm_dtype).itemsize
    flops = 2 * B * (S * Cp + Cp * Cp + Cp) + 4 * B * Cp
    bytes_accessed = B * (S + 2) * 4 + R * Cp * pitem
    cost = pl.CostEstimate(flops=flops, transcendentals=0,
                           bytes_accessed=bytes_accessed)

    # Only raise the scoped-VMEM limit when the estimate approaches v5e's
    # 16 MiB default (large manual block_b); default tiles never need it.
    vmem_est = (2 * block_b * (S + 2) * 4          # double-buffered s, a, out
                + 2 * R * Cp * pitem               # double-buffered packed params
                + 4 * block_b * Cp * 4)            # h / x temporaries + slack
    cp_kwargs = dict(dimension_semantics=("parallel",))
    if vmem_est > 12 * 1024 * 1024:
        cp_kwargs["vmem_limit_bytes"] = int(min(vmem_est * 1.5, 64 * 1024 * 1024))

    out = pl.pallas_call(
        kernel,
        out_shape=jax.ShapeDtypeStruct((B, 1), jnp.float32),
        grid_spec=pltpu.PrefetchScalarGridSpec(
            num_scalar_prefetch=0,
            grid=grid,
            in_specs=[
                pl.BlockSpec((block_b, S), lambda i: (i, 0)),    # state
                pl.BlockSpec((block_b, 1), lambda i: (i, 0)),    # action
                # constant block index -> packed params stay VMEM-resident
                pl.BlockSpec((R, Cp), lambda i: (0, 0)),
            ],
            out_specs=pl.BlockSpec((block_b, 1), lambda i: (i, 0)),
        ),
        compiler_params=pltpu.CompilerParams(**cp_kwargs),
        cost_estimate=cost,
    )(s, a, packed_params)
    return out


# -----------------------------------------------------------------------------
# Init + plain-JAX reference
# -----------------------------------------------------------------------------
def init_critic_params(key, state_size, hidden_state, hidden_action):
    """Deterministic synthetic init (uniform, PyTorch-Linear-style bounds)."""
    hidden = hidden_state + hidden_action
    ks = jax.random.split(key, 8)

    def lin(kw, kb, fan_in, fan_out):
        bound = 1.0 / jnp.sqrt(jnp.float32(fan_in))
        w = jax.random.uniform(kw, (fan_in, fan_out), jnp.float32, -bound, bound)
        b = jax.random.uniform(kb, (fan_out,), jnp.float32, -bound, bound)
        return w, b

    ws, bs = lin(ks[0], ks[1], state_size, hidden_state)      # self.ls
    wa, ba = lin(ks[2], ks[3], 1, hidden_action)               # self.la
    w2, b2 = lin(ks[4], ks[5], hidden, hidden)                 # self.l2
    w3, b3 = lin(ks[6], ks[7], hidden, 1)                      # self.l3
    return (ws, bs, wa, ba, w2, b2, w3, b3)


def critic_reference(s, a, params):
    """Plain-JAX reference (mirrors the PyTorch forward exactly)."""
    (ws, bs, wa, ba, w2, b2, w3, b3) = params
    hs = jax.nn.relu(s @ ws + bs)
    ha = jax.nn.relu(a @ wa + ba)
    x = jnp.concatenate([hs, ha], axis=1)
    x = jax.nn.relu(x @ w2 + b2)
    return x @ w3 + b3


if __name__ == "__main__":
    # small shapes consistent with the module
    state_size, hidden_state, hidden_action = 16, 32, 32

    key = jax.random.PRNGKey(0)
    k_p, k_s1, k_a1, k_s2, k_a2 = jax.random.split(key, 5)
    params = init_critic_params(k_p, state_size, hidden_state, hidden_action)

    # --- f32 path, single tile ---
    B1 = 8
    s1 = jax.random.normal(k_s1, (B1, state_size), jnp.float32)
    a1 = jax.random.normal(k_a1, (B1, 1), jnp.float32)
    packed_f32, meta = pack_critic_params(params, state_size, hidden_state,
                                          hidden_action)
    out1 = jax.block_until_ready(critic_forward(s1, a1, packed_f32, meta))
    ref1 = critic_reference(s1, a1, params)
    assert out1.shape == (B1, 1)
    assert jnp.allclose(out1, ref1, atol=1e-5, rtol=1e-5), (out1, ref1)

    # --- f32 path, multi-step grid with a ragged final tile (no wrapper pad) ---
    B2 = 100
    s2 = jax.random.normal(k_s2, (B2, state_size), jnp.float32)
    a2 = jax.random.normal(k_a2, (B2, 1), jnp.float32)
    out2 = jax.block_until_ready(
        critic_forward(s2, a2, packed_f32, meta, block_b=32))
    ref2 = critic_reference(s2, a2, params)
    assert out2.shape == (B2, 1)
    assert jnp.allclose(out2, ref2, atol=1e-5, rtol=1e-5), (out2, ref2)

    # --- bf16-weight / f32-accumulate MXU fast path (valid on v5e/v6e/v7x) ---
    packed_bf16, meta_b = pack_critic_params(params, state_size, hidden_state,
                                             hidden_action,
                                             param_dtype=jnp.bfloat16)
    out3 = jax.block_until_ready(critic_forward(s1, a1, packed_bf16, meta_b))
    assert out3.shape == (B1, 1)
    assert jnp.allclose(out3, ref1, atol=5e-2, rtol=5e-2), (out3, ref1)

    print("KERNEL_OK")
</pallas_src>

<mosaic_0001>
module attributes {stable_mosaic.version = 11 : i64} {
  func.func @kernel(%arg0: i32, %arg1: memref<8x16xf32, #tpu.memory_space<vmem>>, %arg2: memref<8x1xf32, #tpu.memory_space<vmem>>, %arg3: memref<288x128xf32, #tpu.memory_space<vmem>>, %arg4: memref<8x1xf32, #tpu.memory_space<vmem>>) attributes {dimension_semantics = [#tpu.dimension_semantics<parallel>], iteration_bounds = array<i64: 1>, scalar_prefetch = 0 : i64, scratch_operands = 0 : i64, tpu.core_type = #tpu.core_type<tc>, window_params = [{transform_indices = @transform_0, window_bounds = array<i64: 8, 16>}, {transform_indices = @transform_1, window_bounds = array<i64: 8, 1>}, {pipeline_mode = #tpu.pipeline_mode<synchronous>, transform_indices = @transform_2, window_bounds = array<i64: 288, 128>}, {transform_indices = @transform_3, window_bounds = array<i64: 8, 1>}]} {
    %c0 = arith.constant 0 : index
    %c0_0 = arith.constant 0 : index
    %0 = vector.load %arg1[%c0, %c0_0] : memref<8x16xf32, #tpu.memory_space<vmem>>, vector<8x16xf32>
    %c0_1 = arith.constant 0 : index
    %c0_2 = arith.constant 0 : index
    %1 = vector.load %arg2[%c0_1, %c0_2] : memref<8x1xf32, #tpu.memory_space<vmem>>, vector<8x1xf32>
    %c0_3 = arith.constant 0 : index
    %c0_4 = arith.constant 0 : index
    %2 = vector.load %arg3[%c0_3, %c0_4] : memref<288x128xf32, #tpu.memory_space<vmem>>, vector<1x128xf32>
    %c1 = arith.constant 1 : index
    %c0_5 = arith.constant 0 : index
    %3 = vector.load %arg3[%c1, %c0_5] : memref<288x128xf32, #tpu.memory_space<vmem>>, vector<1x1xf32>
    %c2 = arith.constant 2 : index
    %c0_6 = arith.constant 0 : index
    %4 = vector.load %arg3[%c2, %c0_6] : memref<288x128xf32, #tpu.memory_space<vmem>>, vector<1x128xf32>
    %c8 = arith.constant 8 : index
    %c0_7 = arith.constant 0 : index
    %5 = vector.load %arg3[%c8, %c0_7] : memref<288x128xf32, #tpu.memory_space<vmem>>, vector<16x128xf32>
    %c24 = arith.constant 24 : index
    %c0_8 = arith.constant 0 : index
    %6 = vector.load %arg3[%c24, %c0_8] : memref<288x128xf32, #tpu.memory_space<vmem>>, vector<1x128xf32>
    %c32 = arith.constant 32 : index
    %c0_9 = arith.constant 0 : index
    %7 = vector.load %arg3[%c32, %c0_9] : memref<288x128xf32, #tpu.memory_space<vmem>>, vector<128x128xf32>
    %c160 = arith.constant 160 : index
    %c0_10 = arith.constant 0 : index
    %8 = vector.load %arg3[%c160, %c0_10] : memref<288x128xf32, #tpu.memory_space<vmem>>, vector<128x1xf32>
    %cst = arith.constant dense<0.000000e+00> : vector<8x128xf32>
    %9 = tpu.matmul %0, %5, %cst {dimension_numbers = #tpu.dot_dimension_numbers<[1], [0], [0], [1], [0, 0, 1, 1], [], []>} : vector<8x16xf32>, vector<16x128xf32>, vector<8x128xf32> -> vector<8x128xf32>
    %10 = vector.broadcast %1 : vector<8x1xf32> to vector<8x128xf32>
    %11 = vector.broadcast %6 : vector<1x128xf32> to vector<8x128xf32>
    %12 = arith.mulf %10, %11 : vector<8x128xf32>
    %13 = arith.addf %9, %12 : vector<8x128xf32>
    %14 = vector.broadcast %2 : vector<1x128xf32> to vector<8x128xf32>
    %15 = arith.addf %13, %14 : vector<8x128xf32>
    %cst_11 = arith.constant 0.000000e+00 : f32
    %16 = vector.broadcast %cst_11 : f32 to vector<8x128xf32>
    %17 = arith.maximumf %15, %16 : vector<8x128xf32>
    %cst_12 = arith.constant dense<0.000000e+00> : vector<8x128xf32>
    %18 = tpu.matmul %17, %7, %cst_12 {dimension_numbers = #tpu.dot_dimension_numbers<[1], [0], [0], [1], [0, 0, 1, 1], [], []>} : vector<8x128xf32>, vector<128x128xf32>, vector<8x128xf32> -> vector<8x128xf32>
    %19 = vector.broadcast %4 : vector<1x128xf32> to vector<8x128xf32>
    %20 = arith.addf %18, %19 : vector<8x128xf32>
    %cst_13 = arith.constant 0.000000e+00 : f32
    %21 = vector.broadcast %cst_13 : f32 to vector<8x128xf32>
    %22 = arith.maximumf %20, %21 : vector<8x128xf32>
    %cst_14 = arith.constant dense<0.000000e+00> : vector<8x1xf32>
    %23 = tpu.matmul %22, %8, %cst_14 {dimension_numbers = #tpu.dot_dimension_numbers<[1], [0], [0], [1], [0, 0, 1, 1], [], []>} : vector<8x128xf32>, vector<128x1xf32>, vector<8x1xf32> -> vector<8x1xf32>
    %24 = vector.broadcast %3 : vector<1x1xf32> to vector<8x1xf32>
    %25 = arith.addf %23, %24 : vector<8x1xf32>
    %c0_15 = arith.constant 0 : index
    %c0_16 = arith.constant 0 : index
    %26 = vector.load %arg4[%c0_15, %c0_16] : memref<8x1xf32, #tpu.memory_space<vmem>>, vector<8x1xf32>
    tpu.vector_store %arg4[%c0_15, %c0_16], %25 {strides = array<i32>} : memref<8x1xf32, #tpu.memory_space<vmem>>, vector<8x1xf32>,
    return
  }
  func.func @transform_0(%arg0: i32) -> (i32, i32) {
    %c0_i32 = arith.constant 0 : i32
    %c0_i32_0 = arith.constant 0 : i32
    return %arg0, %c0_i32 : i32, i32
  }
  func.func @transform_1(%arg0: i32) -> (i32, i32) {
    %c0_i32 = arith.constant 0 : i32
    %c0_i32_0 = arith.constant 0 : i32
    return %arg0, %c0_i32 : i32, i32
  }
  func.func @transform_2(%arg0: i32) -> (i32, i32) {
    %c0_i32 = arith.constant 0 : i32
    %c0_i32_0 = arith.constant 0 : i32
    %c0_i32_1 = arith.constant 0 : i32
    return %c0_i32, %c0_i32_0 : i32, i32
  }
  func.func @transform_3(%arg0: i32) -> (i32, i32) {
    %c0_i32 = arith.constant 0 : i32
    %c0_i32_0 = arith.constant 0 : i32
    return %arg0, %c0_i32 : i32, i32
  }
}

</mosaic_0001>

<bundles_post_ra>
// kernel: tpu_custom_call.1
= control target key start
LH: loop header
LB: loop body
LE: loop exit
PB: predicated region body
PF: predicated region fallthrough
CT: control target
= control target key end

     0   :  { %8 = vsyncpa [#allocation3], 0  ;;  %s516_s12 = smov [#allocation2]   ;;  %s584_s0 = inlined_call_operand.vmem [shape: f32[8,16], index: 0, kind: input, shape index: {}]   ;;  %s585_s1 = inlined_call_operand.vmem [shape: f32[8,1], index: 1, kind: input, shape index: {}]   ;;  %s586_s2 = inlined_call_operand.hbm [shape: f32[288,128], index: 2, kind: input, shape index: {}]   ;;  %s587_s3 = inlined_call_operand.vmem [shape: f32[8,1], index: 3, kind: output, shape index: {}]  }
   0x1   :  { %s18_s13 = sshll.u32 %s516_s12, 4  ;;  %s492_s16 = scalar_lea.hbm %s586_s2, 4608  ;;  %s19_s13 = int_to_ptr.vmem [resolvable:$true] %s18_s13 }
   0x2   :  { %p493_p0 = scmp.ne.s32.totalorder %s586_s2, %s492_s16  ;;  %p496_p1 = scmp.lt.u32.totalorder %s492_s16, %s586_s2 }
   0x4   :  { %p498_p2 = pnand %p496_p1, %p493_p0 }
   0x6   :  { %501 = shalt.err (!%p498_p2)
}
   0x7   :  { %s502_s21 = scalar_lea.vmem %s19_s13, 4608  ;;  %p507_p4 = scmp.lt.s32.totalorder %s19_s13, %s19_s13 }
   0x8   :  { %p503_p3 = scmp.ne.s32.totalorder %s19_s13, %s502_s21  ;;  %p508_p5 = scmp.lt.s32.totalorder %s502_s21, %s502_s21 }
   0xa   :  { %p509_p6 = por %p508_p5, %p507_p4 }
   0xc   :  { %p510_p7 = pnand %p509_p6, %p503_p3 }
   0xe   :  { %513 = shalt.err (!%p510_p7)
}
   0xf   :  { %s517_s22 = smov 128   ;;  %s518_s23 = smov 8  }
  0x10   :  { %24 = dma.hbm_to_vmem [thread:$0]  %s586_s2, 4608, %s19_s13, [#allocation3], %s517_s22, %s517_s22, %s518_s23  }
  0x11   :  { %514 = dma.done.wait [#allocation3], 4608  }
  0x12   :  { %515 = vsyncadd [#allocation3], 4294962688  ;;  %v519_v0 = vmov 0.0|0.0   ;;  %vm520_vm0 = vmmov 0   ;;  %v521_v1 = vmov 0.0   ;;  %v522_v2 = vmov 0  }
  0x13   :  { %433 = vmatprep.subr.bf16.mxu0 %v519_v0  ;;  %360 = vmatprep.mubr.msk.f32.mxu0 %vm520_vm0, %v521_v1  ;;  %v33_v3 = vld [vmem:[#allocation2 + $0x8] sm:$0xff]  ;;  %v34_v4 = vld [vmem:[#allocation2 + $0x10] sm:$0xff]  ;;  %v29_v6 = vld [vmem:[%s585_s1] sm:$0xff]  ;;  %vm78_vm1 = vcmask 130048   ;;  %vm307_vm2 = vcmask 7168  }
  0x14   :  { %491 = vset.pattern.permute.xlu0 %v522_v2  ;;  %436 = vmatprep.subr.bf16.mxu1 %v519_v0  ;;  %v434_v5 = vpack.c.bf16 %v34_v4, %v33_v3  ;;  %v36_v7 = vld [vmem:[#allocation2 + $0x20] sm:$0xff]  ;;  %v37_v8 = vld [vmem:[#allocation2 + $0x28] sm:$0xff]  ;;  %v38_v10 = vld [vmem:[#allocation2 + $0x30] sm:$0xff] }
  0x15   :  { %395 = vmatprep.mubr.msk.f32.mxu1 %vm520_vm0, %v521_v1  ;;  %70 = vperm.xlu0 %491, %v29_v6   ;;  %v437_v9 = vpack.c.bf16 %v37_v8, %v36_v7  ;;  %v39_v11 = vld [vmem:[#allocation2 + $0x38] sm:$0xff]  ;;  %v28_v12 = vld [vmem:[%s584_s0] sm:$0xff]  ;;  %v41_v15 = vld [vmem:[#allocation2 + $0x48] sm:$0xff] }
  0x16   :  { %435 = vmatpush3.bf16.msra.mxu0 %v434_v5  ;;  %v440_v13 = vpack.c.bf16 %v39_v11, %v38_v10  ;;  %v40_v14 = vld [vmem:[#allocation2 + $0x40] sm:$0xff]  ;;  %v42_v17 = vld [vmem:[#allocation2 + $0x50] sm:$0xff]  ;;  %v43_v18 = vld [vmem:[#allocation2 + $0x58] sm:$0xff] }
  0x17   :  { %438 = vmatpush3.bf16.msra.mxu1 %v437_v9  ;;  %460 = vmatprep.subr.bf16.mxu0 %v519_v0  ;;  %v443_v16 = vpack.c.bf16 %v41_v15, %v40_v14  ;;  %v446_v19 = vpack.c.bf16 %v43_v18, %v42_v17  ;;  %v44_v20 = vld [vmem:[#allocation2 + $0x60] sm:$0xff]  ;;  %v45_v21 = vld [vmem:[#allocation2 + $0x68] sm:$0xff]  ;;  %v46_v23 = vld [vmem:[#allocation2 + $0x70] sm:$0xff] }
  0x18   :  { %439 = vmatprep.subr.bf16.mxu1 %v519_v0  ;;  %v449_v22 = vpack.c.bf16 %v45_v21, %v44_v20  ;;  %v47_v24 = vld [vmem:[#allocation2 + $0x78] sm:$0xff]  ;;  %v48_v26 = vld [vmem:[#allocation2 + $0x80] sm:$0xff]  ;;  %v49_v27 = vld [vmem:[#allocation2 + $0x88] sm:$0xff] }
  0x19   :  { %361 = vmatmul.mubr.msk.f32.vlgmr.msra.gmra.mrb[0].mxu0 %vm78_vm1, %v28_v12  ;;  %v452_v25 = vpack.c.bf16 %v47_v24, %v46_v23  ;;  %v455_v28 = vpack.c.bf16 %v49_v27, %v48_v26  ;;  %v50_v29 = vld [vmem:[#allocation2 + $0x90] sm:$0xff]  ;;  %v51_v30 = vld [vmem:[#allocation2 + $0x98] sm:$0xff]  ;;  %v52_v32 = vld [vmem:[#allocation2 + $0xa0] sm:$0xff] }
  0x1a   :  { %430 = vmatprep.mubr.msk.f32.mxu0 %vm520_vm0, %v521_v1  ;;  %v458_v31 = vpack.c.bf16 %v51_v30, %v50_v29  ;;  %v53_v33 = vld [vmem:[#allocation2 + $0xa8] sm:$0xff]  ;;  %v54_v34 = vld [vmem:[#allocation2 + $0xb0] sm:$0xff]  ;;  %v55_v36 = vld [vmem:[#allocation2 + $0xb8] sm:$0xff] }
  0x1b   :  { %441 = vmatpush3.bf16.msra.mxu1 %v440_v13  ;;  %v461_v35 = vpack.c.bf16 %v53_v33, %v52_v32  ;;  %v464_v37 = vpack.c.bf16 %v55_v36, %v54_v34  ;;  %v56_v38 = vld [vmem:[#allocation2 + $0xc0] sm:$0xff]  ;;  %v57_v39 = vld [vmem:[#allocation2 + $0xc8] sm:$0xff]  ;;  %v58_v41 = vld [vmem:[#allocation2 + $0xd0] sm:$0xff] }
  0x1c   :  { %442 = vmatprep.subr.bf16.mxu1 %v519_v0  ;;  %v467_v40 = vpack.c.bf16 %v57_v39, %v56_v38  ;;  %v59_v42 = vld [vmem:[#allocation2 + $0xd8] sm:$0xff]  ;;  %v60_v44 = vld [vmem:[#allocation2 + $0xe0] sm:$0xff]  ;;  %v61_v45 = vld [vmem:[#allocation2 + $0xe8] sm:$0xff] }
  0x1d   :  { %462 = vmatpush3.bf16.msra.mxu0 %v461_v35  ;;  %v470_v43 = vpack.c.bf16 %v59_v42, %v58_v41  ;;  %v473_v46 = vpack.c.bf16 %v61_v45, %v60_v44  ;;  %v62_v47 = vld [vmem:[#allocation2 + $0xf0] sm:$0xff]  ;;  %v63_v48 = vld [vmem:[#allocation2 + $0xf8] sm:$0xff]  ;;  %v64_v50 = vld [vmem:[#allocation2 + $0x100] sm:$0xff] }
  0x1e   :  { %463 = vmatprep.subr.bf16.mxu0 %v519_v0  ;;  %v476_v49 = vpack.c.bf16 %v63_v48, %v62_v47  ;;  %v65_v51 = vld [vmem:[#allocation2 + $0x108] sm:$0xff]  ;;  %v314_v53 = vld [vmem:[#allocation2 + $0x18] ss:$0 sm:$0xff]  ;;  %v316_v56 = vld [vmem:[#allocation2] ss:$0 sm:$0xff] }
  0x1f   :  { %444 = vmatpush3.bf16.msra.mxu1 %v443_v16  ;;  %v479_v52 = vpack.c.bf16 %v65_v51, %v64_v50  ;;  %v66_v62 = vld [vmem:[#allocation2 + $0x110] sm:$0xff]  ;;  %v67_v63 = vld [vmem:[#allocation2 + $0x118] sm:$0xff]  ;;  %v317_v2 = vld [vmem:[#allocation2 + $0x2] ss:$0 sm:$0xff] }
  0x20   :  { %445 = vmatprep.subr.bf16.mxu1 %v519_v0  ;;  %v482_v1 = vpack.c.bf16 %v67_v63, %v66_v62 }
  0x21   :  { %465 = vmatpush3.bf16.msra.mxu0 %v464_v37 }
  0x22   :  { %466 = vmatprep.subr.bf16.mxu0 %v519_v0 }
  0x23   :  { %447 = vmatpush3.bf16.msra.mxu1 %v446_v19 }
  0x24   :  { %448 = vmatprep.subr.bf16.mxu1 %v519_v0 }
  0x25   :  { %468 = vmatpush3.bf16.msra.mxu0 %v467_v40 }
  0x26   :  { %469 = vmatprep.subr.bf16.mxu0 %v519_v0 }
  0x27   :  { %450 = vmatpush3.bf16.msra.mxu1 %v449_v22 }
  0x28   :  { %451 = vmatprep.subr.bf16.mxu1 %v519_v0 }
  0x29   :  { %471 = vmatpush3.bf16.msra.mxu0 %v470_v43 }
  0x2a   :  { %472 = vmatprep.subr.bf16.mxu0 %v519_v0 }
  0x2b   :  { %453 = vmatpush3.bf16.msra.mxu1 %v452_v25 }
  0x2c   :  { %454 = vmatprep.subr.bf16.mxu1 %v519_v0 }
  0x2d   :  { %474 = vmatpush3.bf16.msra.mxu0 %v473_v46 }
  0x2e   :  { %475 = vmatprep.subr.bf16.mxu0 %v519_v0 }
  0x2f   :  { %456 = vmatpush3.bf16.msra.mxu1 %v455_v28 }
  0x30   :  { %457 = vmatprep.subr.bf16.mxu1 %v519_v0 }
  0x31   :  { %477 = vmatpush3.bf16.msra.mxu0 %v476_v49 }
  0x32   :  { %478 = vmatprep.subr.bf16.mxu0 %v519_v0 }
  0x33   :  { %459 = vmatpush3.bf16.msra.mxu1 %v458_v31 }
  0x35   :  { %480 = vmatpush3.bf16.msra.mxu0 %v479_v52 }
  0x36   :  { %481 = vmatprep.subr.bf16.mxu0 %v519_v0  ;;  %v318_v0 = vld [vmem:[#allocation2 + $0x1] ss:$0 sm:$0xff] }
  0x39   :  { %483 = vmatpush3.bf16.msra.mxu0 %v482_v1 }
  0x94   :  { %v71_v54 = vpop.permute.xlu0 %70 }
  0x95   :  { %v77_v55 = vmul.f32 %v314_v53, %v71_v54 }
  0xec   :  { %v148_v57 = vpop.f32.mrb[0].mxu0 }
  0xed   :  { %v149_v58 = vadd.f32 %v148_v57, %v77_v55  ;;  %v362_v59 = vpop.f32.mrb[1].mxu0 }
  0xef   :  { %v156_v60 = vadd.f32 %v316_v56, %v149_v58 }
  0xf1   :  { %v157_v61 = vmax.f32 %v156_v60, 0.0 }
  0xf3   :  { %396 = vmatmul.mubr.f32.vlgmr.msra.gmra.mrb[0].mxu1 %v157_v61 }
 0x1c6   :  { %v228_v3 = vpop.f32.mrb[0].mxu1 }
 0x1c7   :  { %v229_v4 = vadd.f32 %v317_v2, %v228_v3  ;;  %v397_v5 = vpop.f32.mrb[1].mxu1 }
 0x1c9   :  { %v232_v6 = vmax.f32 %v229_v4, 0.0 }
 0x1cb   :  { %431 = vmatmul.mubr.f32.vlgmr.msra.gmra.mrb[2].mxu0 %v232_v6 }
 0x29e   :  { %v303_v7 = vpop.f32.mrb[2].mxu0 }
 0x29f   :  { %v304_v8 = vadd.f32 %v318_v0, %v303_v7  ;;  %v432_v9 = vpop.f32.mrb[3].mxu0 }
 0x2a1   :  { %308 = vst.msk [vmem:[%s587_s3] sm:$0xff] %vm307_vm2, %v304_v8 }
 0x2a2   :  { %313 = vsyncpa [#allocation3], 1 }

</bundles_post_ra>
